<compile_context>
chip_gen: v7x
topology: tpu7x:2x2x1
jax: 0.10.0
libtpu: 0.0.40
codegen_flags: <defaults>
</compile_context>

<pallas_src>
import functools

import jax
import jax.numpy as jnp
from jax.experimental import pallas as pl
from jax.experimental.pallas import tpu as pltpu

_BN_EPS = 1e-5
_LANE = 128
_MAX_L_TILE = 256  # (L_tile, Cout_tile) sized for the register file / v7x VMEM


def _round_up(x, m):
    return (x + m - 1) // m * m


# ----------------------------------------------------------------------------
# Fused kernel: conv1d ('same', stride 1) + folded BN + optional (projected)
# residual add + optional ReLU, for one (batch, L-tile) grid point.
# ----------------------------------------------------------------------------
def _conv_bn_kernel(*refs, K, L_tile, L_valid, L_pad, relu, has_residual, has_proj):
    win_ref = refs[-1]          # VMEM scratch window: (L_tile + 16, Cin_p)
    o_ref = refs[-2]
    ins = refs[:-2]
    if has_residual and has_proj:
        (xl_ref, xc_ref, xr_ref, w_ref, sc_ref, sh_ref,
         r_ref, pw_ref, psc_ref, psh_ref) = ins
    elif has_residual:
        xl_ref, xc_ref, xr_ref, w_ref, sc_ref, sh_ref, r_ref = ins
    else:
        xl_ref, xc_ref, xr_ref, w_ref, sc_ref, sh_ref = ins

    i = pl.program_id(1)
    n_l = pl.num_programs(1)
    halo_l = K // 2

    # Assemble the halo window in VMEM scratch (8-aligned stores only).
    # Halo blocks are zeroed at the sequence boundaries (= conv zero padding).
    xl = xl_ref[...]
    xr = xr_ref[...]
    win_ref[0:8, :] = jnp.where(i > 0, xl, jnp.zeros_like(xl))
    win_ref[8:8 + L_tile, :] = xc_ref[...]
    win_ref[8 + L_tile:8 + L_tile + 8, :] = jnp.where(i < n_l - 1, xr, jnp.zeros_like(xr))

    # im2col over the K taps -> single MXU matmul with reduction depth K*Cin.
    off = 8 - halo_l
    taps = [win_ref[off + k: off + k + L_tile, :] for k in range(K)]
    cols = jnp.concatenate(taps, axis=1) if K > 1 else taps[0]

    acc = jnp.dot(cols, w_ref[...], preferred_element_type=jnp.float32)
    y = acc * sc_ref[...] + sh_ref[...]            # folded BN, f32 epilogue

    if has_residual:
        if has_proj:                               # fused 1x1 downsample conv + BN
            r = jnp.dot(r_ref[...], pw_ref[...], preferred_element_type=jnp.float32)
            r = r * psc_ref[...] + psh_ref[...]
        else:
            r = r_ref[...].astype(jnp.float32)
        y = y + r

    if relu:
        y = jnp.maximum(y, 0.0)

    if L_pad > L_valid:
        # Zero rows beyond the true sequence length so downstream stages see
        # correct conv zero-padding.
        rows = i * L_tile + jax.lax.broadcasted_iota(jnp.int32, (L_tile, 1), 0)
        y = jnp.where(rows < L_valid, y, 0.0)

    o_ref[...] = y.astype(o_ref.dtype)


def conv1d_bn_act(x, w2d, scale, shift, *, K, L_valid, L_tile, relu, out_dtype,
                  residual=None, proj_w=None, proj_scale=None, proj_shift=None):
    """x: (B, L_pad, Cin_p), L_pad multiple of L_tile (mult. of 8), Cin_p mult. of 128.
    w2d: (K*Cin_p, Cout_p) bf16; scale/shift: (1, Cout_p) f32.
    Returns (B, L_pad, Cout_p) with rows >= L_valid zeroed."""
    B, L_pad, Cin_p = x.shape
    Cout_p = w2d.shape[1]
    assert K % 2 == 1 and K <= 17, "odd kernel size <= 17 required"
    assert L_pad % L_tile == 0 and L_tile % 8 == 0
    assert Cin_p % _LANE == 0 and Cout_p % _LANE == 0
    n_l = L_pad // L_tile
    r8 = L_tile // 8
    n8 = L_pad // 8

    has_residual = residual is not None
    has_proj = proj_w is not None

    in_specs = [
        # left 8-row halo, center tile, right 8-row halo (same input array)
        pl.BlockSpec((None, 8, Cin_p),
                     lambda b, i: (b, jnp.maximum(i * r8 - 1, 0), 0)),
        pl.BlockSpec((None, L_tile, Cin_p), lambda b, i: (b, i, 0)),
        pl.BlockSpec((None, 8, Cin_p),
                     lambda b, i: (b, jnp.minimum((i + 1) * r8, n8 - 1), 0)),
        # weights / BN params: constant index maps -> stay VMEM-resident
        pl.BlockSpec((K * Cin_p, Cout_p), lambda b, i: (0, 0)),
        pl.BlockSpec((1, Cout_p), lambda b, i: (0, 0)),
        pl.BlockSpec((1, Cout_p), lambda b, i: (0, 0)),
    ]
    operands = [x, x, x, w2d, scale, shift]
    if has_residual:
        Cr_p = residual.shape[-1]
        in_specs.append(pl.BlockSpec((None, L_tile, Cr_p), lambda b, i: (b, i, 0)))
        operands.append(residual)
        if has_proj:
            in_specs += [
                pl.BlockSpec((Cr_p, Cout_p), lambda b, i: (0, 0)),
                pl.BlockSpec((1, Cout_p), lambda b, i: (0, 0)),
                pl.BlockSpec((1, Cout_p), lambda b, i: (0, 0)),
            ]
            operands += [proj_w, proj_scale, proj_shift]

    kernel = functools.partial(
        _conv_bn_kernel, K=K, L_tile=L_tile, L_valid=L_valid, L_pad=L_pad,
        relu=relu, has_residual=has_residual, has_proj=has_proj)

    return pl.pallas_call(
        kernel,
        out_shape=jax.ShapeDtypeStruct((B, L_pad, Cout_p), out_dtype),
        grid=(B, n_l),
        in_specs=in_specs,
        out_specs=pl.BlockSpec((None, L_tile, Cout_p), lambda b, i: (b, i, 0)),
        scratch_shapes=[pltpu.VMEM((L_tile + 16, Cin_p), x.dtype)],
        compiler_params=pltpu.CompilerParams(
            dimension_semantics=("parallel", "parallel")),
    )(*operands)


# ----------------------------------------------------------------------------
# Parameter handling
# ----------------------------------------------------------------------------
def _fold_bn(gamma, beta, mean, var):
    scale = gamma / jnp.sqrt(var + _BN_EPS)
    shift = beta - mean * scale
    return scale, shift


def _choose_tile(length):
    if length <= _MAX_L_TILE:
        lt = _round_up(length, 8)
    else:
        lt = _MAX_L_TILE
    return lt, _round_up(length, lt)


def _pad_rows(a, lp):
    cur = a.shape[1]
    if cur > lp:
        a = a[:, :lp, :]
    elif cur < lp:
        a = jnp.pad(a, ((0, 0), (0, lp - cur), (0, 0)))
    return a


def _prep_conv(w_kio, bn, cin, cin_p, cout, cout_p):
    """Fold BN into per-channel scale/shift, zero-pad channels, and reshape the
    bf16 weight to (K*Cin_p, Cout_p) for the merged-tap matmul."""
    s, b = _fold_bn(*bn)
    kk = w_kio.shape[0]
    w = jnp.zeros((kk, cin_p, cout_p), jnp.float32).at[:, :cin, :cout].set(w_kio)
    w2d = w.reshape(kk * cin_p, cout_p).astype(jnp.bfloat16)
    s_p = jnp.ones((1, cout_p), jnp.float32).at[0, :cout].set(s)
    b_p = jnp.zeros((1, cout_p), jnp.float32).at[0, :cout].set(b)
    return w2d, s_p, b_p


def init_residual_block_params(key, cin, cout, kernel_sizes=(7, 11, 7), stride=1):
    ks = tuple(kernel_sizes)
    assert len(ks) == 3 and all(k % 2 == 1 for k in ks), "odd kernel sizes only"
    keys = jax.random.split(key, 16)
    p = {}

    def conv_w(k, kk, c_in, c_out):
        # PyTorch layout (Cout, Cin, K) -> kernel layout (K, Cin, Cout)
        w = jax.random.normal(k, (c_out, c_in, kk), jnp.float32) * 0.1
        return jnp.transpose(w, (2, 1, 0))

    def bn(k1, k2, k3, k4, c):
        gamma = jax.random.uniform(k1, (c,), jnp.float32, 0.8, 1.2)
        beta = jax.random.normal(k2, (c,), jnp.float32) * 0.05
        mean = jax.random.normal(k3, (c,), jnp.float32) * 0.05
        var = jax.random.uniform(k4, (c,), jnp.float32, 0.5, 1.5)
        return gamma, beta, mean, var

    p["w1"] = conv_w(keys[0], ks[0], cin, cout)
    p["bn1"] = bn(keys[1], keys[2], keys[3], keys[4], cout)
    p["w2"] = conv_w(keys[5], ks[1], cout, cout)
    p["bn2"] = bn(keys[6], keys[7], keys[8], keys[9], cout)
    p["w3"] = conv_w(keys[10], ks[2], cout, cout)
    p["bn3"] = bn(keys[11], keys[12], keys[13], keys[14], cout)

    p["has_downsample"] = (stride != 1) or (cin != cout)
    if p["has_downsample"]:
        dkeys = jax.random.split(keys[15], 5)
        p["wd"] = conv_w(dkeys[0], 1, cin, cout)
        p["bnd"] = bn(dkeys[1], dkeys[2], dkeys[3], dkeys[4], cout)

    p["stride"] = stride
    p["kernel_sizes"] = ks
    return p


# ----------------------------------------------------------------------------
# ResidualBlock forward (PyTorch NCL convention at the boundary)
# ----------------------------------------------------------------------------
def residual_block_forward(params, x_ncl):
    """x_ncl: (B, Cin, L) -> (B, Cout, ceil(L / stride))."""
    stride = params["stride"]
    k1, k2, k3 = params["kernel_sizes"]
    B, Cin, L = x_ncl.shape
    Cout = params["w1"].shape[-1]

    cin_p = _round_up(Cin, _LANE)
    cout_p = _round_up(Cout, _LANE)

    # channels-last, channel-padded, bf16 inter-stage storage
    x = jnp.transpose(x_ncl, (0, 2, 1))
    x = jnp.pad(x, ((0, 0), (0, 0), (0, cin_p - Cin))).astype(jnp.bfloat16)

    lt1, lp1 = _choose_tile(L)
    x1 = _pad_rows(x, lp1)

    w1, s1, b1 = _prep_conv(params["w1"], params["bn1"], Cin, cin_p, Cout, cout_p)
    w2, s2, b2 = _prep_conv(params["w2"], params["bn2"], Cout, cout_p, Cout, cout_p)
    w3, s3, b3 = _prep_conv(params["w3"], params["bn3"], Cout, cout_p, Cout, cout_p)

    # conv1: conv + BN + ReLU
    h = conv1d_bn_act(x1, w1, s1, b1, K=k1, L_valid=L, L_tile=lt1,
                      relu=True, out_dtype=jnp.bfloat16)
    # conv2: conv + BN + ReLU (Dropout == identity in eval)
    h = conv1d_bn_act(h, w2, s2, b2, K=k2, L_valid=L, L_tile=lt1,
                      relu=True, out_dtype=jnp.bfloat16)

    if stride != 1:
        # TODO(synk): compute strided rows directly in-kernel instead of subsampling.
        L2 = -(-L // stride)
        lt3, lp3 = _choose_tile(L2)
        h = _pad_rows(h[:, ::stride, :], lp3)
        r = x[:, ::stride, :]
    else:
        L2, lt3, lp3 = L, lt1, lp1
        r = x
    r = _pad_rows(r, lp3)

    # conv3: conv + BN, fused with (1x1 downsample conv + BN) residual add + final ReLU
    if params["has_downsample"]:
        wd, sd, bd = _prep_conv(params["wd"], params["bnd"], Cin, cin_p, Cout, cout_p)
        out = conv1d_bn_act(h, w3, s3, b3, K=k3, L_valid=L2, L_tile=lt3,
                            relu=True, out_dtype=jnp.float32,
                            residual=r, proj_w=wd, proj_scale=sd, proj_shift=bd)
    else:
        out = conv1d_bn_act(h, w3, s3, b3, K=k3, L_valid=L2, L_tile=lt3,
                            relu=True, out_dtype=jnp.float32, residual=r)

    out = out[:, :L2, :Cout]
    return jnp.transpose(out, (0, 2, 1))


# ----------------------------------------------------------------------------
# Pure-JAX f32 reference (lax conv) for correctness check
# ----------------------------------------------------------------------------
def _ref_conv_bn(x_ncl, w_kio, scale, shift, stride, relu):
    K = w_kio.shape[0]
    w_oik = jnp.transpose(w_kio, (2, 1, 0))  # (Cout, Cin, K)
    y = jax.lax.conv_general_dilated(
        x_ncl, w_oik, window_strides=(stride,), padding=[(K // 2, K // 2)],
        dimension_numbers=("NCH", "OIH", "NCH"))
    y = y * scale[None, :, None] + shift[None, :, None]
    if relu:
        y = jnp.maximum(y, 0.0)
    return y


def residual_block_reference(params, x_ncl):
    stride = params["stride"]
    s1, b1 = _fold_bn(*params["bn1"])
    s2, b2 = _fold_bn(*params["bn2"])
    s3, b3 = _fold_bn(*params["bn3"])
    h = _ref_conv_bn(x_ncl, params["w1"], s1, b1, 1, True)
    h = _ref_conv_bn(h, params["w2"], s2, b2, stride, True)
    h = _ref_conv_bn(h, params["w3"], s3, b3, 1, False)
    if params["has_downsample"]:
        sd, bd = _fold_bn(*params["bnd"])
        res = _ref_conv_bn(x_ncl, params["wd"], sd, bd, stride, False)
    else:
        res = x_ncl
    return jnp.maximum(h + res, 0.0)


# ----------------------------------------------------------------------------
if __name__ == "__main__":
    B, Cin, Cout, L = 2, 4, 8, 16
    key = jax.random.PRNGKey(0)
    k_x, k_p = jax.random.split(key)

    x = jax.random.normal(k_x, (B, Cin, L), jnp.float32)  # PyTorch NCL input
    params = init_residual_block_params(k_p, Cin, Cout, kernel_sizes=(7, 11, 7), stride=1)

    out = jax.block_until_ready(residual_block_forward(params, x))
    ref = jax.block_until_ready(residual_block_reference(params, x))

    assert out.shape == (B, Cout, L), out.shape
    # bf16 inter-stage activations/weights -> compare with a bf16-level tolerance.
    assert jnp.allclose(out, ref, atol=5e-2, rtol=5e-2), float(jnp.max(jnp.abs(out - ref)))
    print("KERNEL_OK")
</pallas_src>

<mosaic_0001>
module attributes {stable_mosaic.version = 11 : i64} {
  func.func @_conv_bn_kernel(%arg0: i32, %arg1: i32, %arg2: memref<1x8x128xbf16, #tpu.memory_space<vmem>>, %arg3: memref<1x16x128xbf16, #tpu.memory_space<vmem>>, %arg4: memref<1x8x128xbf16, #tpu.memory_space<vmem>>, %arg5: memref<896x128xbf16, #tpu.memory_space<vmem>>, %arg6: memref<1x128xf32, #tpu.memory_space<vmem>>, %arg7: memref<1x128xf32, #tpu.memory_space<vmem>>, %arg8: memref<1x16x128xbf16, #tpu.memory_space<vmem>>, %arg9: memref<32x128xbf16, #tpu.memory_space<vmem>>) attributes {dimension_semantics = [#tpu.dimension_semantics<parallel>, #tpu.dimension_semantics<parallel>], iteration_bounds = array<i64: 2, 1>, scalar_prefetch = 0 : i64, scratch_operands = 1 : i64, tpu.core_type = #tpu.core_type<tc>, window_params = [{transform_indices = @transform_0, window_bounds = array<i64: 1, 8, 128>}, {transform_indices = @transform_1, window_bounds = array<i64: 1, 16, 128>}, {transform_indices = @transform_2, window_bounds = array<i64: 1, 8, 128>}, {pipeline_mode = #tpu.pipeline_mode<synchronous>, transform_indices = @transform_3, window_bounds = array<i64: 896, 128>}, {pipeline_mode = #tpu.pipeline_mode<synchronous>, transform_indices = @transform_4, window_bounds = array<i64: 1, 128>}, {pipeline_mode = #tpu.pipeline_mode<synchronous>, transform_indices = @transform_5, window_bounds = array<i64: 1, 128>}, {transform_indices = @transform_6, window_bounds = array<i64: 1, 16, 128>}]} {
    %c0 = arith.constant 0 : index
    %c0_0 = arith.constant 0 : index
    %c0_1 = arith.constant 0 : index
    %0 = vector.load %arg2[%c0, %c0_0, %c0_1] : memref<1x8x128xbf16, #tpu.memory_space<vmem>>, vector<1x8x128xbf16>
    %1 = vector.shape_cast %0 : vector<1x8x128xbf16> to vector<8x128xbf16>
    %c0_2 = arith.constant 0 : index
    %c0_3 = arith.constant 0 : index
    %c0_4 = arith.constant 0 : index
    %2 = vector.load %arg4[%c0_2, %c0_3, %c0_4] : memref<1x8x128xbf16, #tpu.memory_space<vmem>>, vector<1x8x128xbf16>
    %3 = vector.shape_cast %2 : vector<1x8x128xbf16> to vector<8x128xbf16>
    %c0_i32 = arith.constant 0 : i32
    %4 = arith.cmpi sgt, %arg1, %c0_i32 : i32
    %cst = arith.constant 0.000000e+00 : bf16
    %5 = vector.broadcast %cst : bf16 to vector<8x128xbf16>
    %6 = arith.select %4, %1, %5 : vector<8x128xbf16>
    %c0_5 = arith.constant 0 : index
    %c0_6 = arith.constant 0 : index
    %7 = vector.load %arg9[%c0_5, %c0_6] : memref<32x128xbf16, #tpu.memory_space<vmem>>, vector<8x128xbf16>
    tpu.vector_store %arg9[%c0_5, %c0_6], %6 {strides = array<i32>} : memref<32x128xbf16, #tpu.memory_space<vmem>>, vector<8x128xbf16>,
    %c0_7 = arith.constant 0 : index
    %c0_8 = arith.constant 0 : index
    %c0_9 = arith.constant 0 : index
    %8 = vector.load %arg3[%c0_7, %c0_8, %c0_9] : memref<1x16x128xbf16, #tpu.memory_space<vmem>>, vector<1x16x128xbf16>
    %9 = vector.shape_cast %8 : vector<1x16x128xbf16> to vector<16x128xbf16>
    %c8 = arith.constant 8 : index
    %c0_10 = arith.constant 0 : index
    %10 = vector.load %arg9[%c8, %c0_10] : memref<32x128xbf16, #tpu.memory_space<vmem>>, vector<16x128xbf16>
    tpu.vector_store %arg9[%c8, %c0_10], %9 {strides = array<i32>} : memref<32x128xbf16, #tpu.memory_space<vmem>>, vector<16x128xbf16>,
    %c0_i32_11 = arith.constant 0 : i32
    %11 = arith.cmpi slt, %arg1, %c0_i32_11 : i32
    %cst_12 = arith.constant 0.000000e+00 : bf16
    %12 = vector.broadcast %cst_12 : bf16 to vector<8x128xbf16>
    %13 = arith.select %11, %3, %12 : vector<8x128xbf16>
    %c24 = arith.constant 24 : index
    %c0_13 = arith.constant 0 : index
    %14 = vector.load %arg9[%c24, %c0_13] : memref<32x128xbf16, #tpu.memory_space<vmem>>, vector<8x128xbf16>
    tpu.vector_store %arg9[%c24, %c0_13], %13 {strides = array<i32>} : memref<32x128xbf16, #tpu.memory_space<vmem>>, vector<8x128xbf16>,
    %c5 = arith.constant 5 : index
    %c0_14 = arith.constant 0 : index
    %15 = vector.load %arg9[%c5, %c0_14] : memref<32x128xbf16, #tpu.memory_space<vmem>>, vector<16x128xbf16>
    %c6 = arith.constant 6 : index
    %c0_15 = arith.constant 0 : index
    %16 = vector.load %arg9[%c6, %c0_15] : memref<32x128xbf16, #tpu.memory_space<vmem>>, vector<16x128xbf16>
    %c7 = arith.constant 7 : index
    %c0_16 = arith.constant 0 : index
    %17 = vector.load %arg9[%c7, %c0_16] : memref<32x128xbf16, #tpu.memory_space<vmem>>, vector<16x128xbf16>
    %c8_17 = arith.constant 8 : index
    %c0_18 = arith.constant 0 : index
    %18 = vector.load %arg9[%c8_17, %c0_18] : memref<32x128xbf16, #tpu.memory_space<vmem>>, vector<16x128xbf16>
    %c9 = arith.constant 9 : index
    %c0_19 = arith.constant 0 : index
    %19 = vector.load %arg9[%c9, %c0_19] : memref<32x128xbf16, #tpu.memory_space<vmem>>, vector<16x128xbf16>
    %c10 = arith.constant 10 : index
    %c0_20 = arith.constant 0 : index
    %20 = vector.load %arg9[%c10, %c0_20] : memref<32x128xbf16, #tpu.memory_space<vmem>>, vector<16x128xbf16>
    %c11 = arith.constant 11 : index
    %c0_21 = arith.constant 0 : index
    %21 = vector.load %arg9[%c11, %c0_21] : memref<32x128xbf16, #tpu.memory_space<vmem>>, vector<16x128xbf16>
    %22 = tpu.concatenate %15, %16, %17, %18, %19, %20, %21 in 1 : vector<16x128xbf16>, vector<16x128xbf16>, vector<16x128xbf16>, vector<16x128xbf16>, vector<16x128xbf16>, vector<16x128xbf16>, vector<16x128xbf16> -> vector<16x896xbf16>
    %c0_22 = arith.constant 0 : index
    %c0_23 = arith.constant 0 : index
    %23 = vector.load %arg5[%c0_22, %c0_23] : memref<896x128xbf16, #tpu.memory_space<vmem>>, vector<896x128xbf16>
    %cst_24 = arith.constant dense<0.000000e+00> : vector<16x128xf32>
    %24 = tpu.matmul %22, %23, %cst_24 {dimension_numbers = #tpu.dot_dimension_numbers<[1], [0], [0], [1], [0, 0, 1, 1], [], []>} : vector<16x896xbf16>, vector<896x128xbf16>, vector<16x128xf32> -> vector<16x128xf32>
    %c0_25 = arith.constant 0 : index
    %c0_26 = arith.constant 0 : index
    %25 = vector.load %arg6[%c0_25, %c0_26] : memref<1x128xf32, #tpu.memory_space<vmem>>, vector<1x128xf32>
    %26 = vector.broadcast %25 : vector<1x128xf32> to vector<16x128xf32>
    %27 = arith.mulf %24, %26 : vector<16x128xf32>
    %c0_27 = arith.constant 0 : index
    %c0_28 = arith.constant 0 : index
    %28 = vector.load %arg7[%c0_27, %c0_28] : memref<1x128xf32, #tpu.memory_space<vmem>>, vector<1x128xf32>
    %29 = vector.broadcast %28 : vector<1x128xf32> to vector<16x128xf32>
    %30 = arith.addf %27, %29 : vector<16x128xf32>
    %cst_29 = arith.constant 0.000000e+00 : f32
    %31 = vector.broadcast %cst_29 : f32 to vector<16x128xf32>
    %32 = arith.maximumf %30, %31 : vector<16x128xf32>
    %33 = arith.truncf %32 : vector<16x128xf32> to vector<16x128xbf16>
    %c0_30 = arith.constant 0 : index
    %c0_31 = arith.constant 0 : index
    %c0_32 = arith.constant 0 : index
    %34 = vector.load %arg8[%c0_30, %c0_31, %c0_32] : memref<1x16x128xbf16, #tpu.memory_space<vmem>>, vector<1x16x128xbf16>
    %35 = vector.shape_cast %34 : vector<1x16x128xbf16> to vector<16x128xbf16>
    %36 = vector.shape_cast %33 : vector<16x128xbf16> to vector<1x16x128xbf16>
    tpu.vector_store %arg8[%c0_30, %c0_31, %c0_32], %36 {strides = array<i32>} : memref<1x16x128xbf16, #tpu.memory_space<vmem>>, vector<1x16x128xbf16>,
    return
  }
  func.func @transform_0(%arg0: i32, %arg1: i32) -> (i32, i32, i32) {
    %c2_i32 = arith.constant 2 : i32
    %0 = arith.muli %arg1, %c2_i32 : i32
    %c1_i32 = arith.constant 1 : i32
    %1 = arith.subi %0, %c1_i32 : i32
    %c0_i32 = arith.constant 0 : i32
    %2 = arith.maxsi %1, %c0_i32 : i32
    %c0_i32_0 = arith.constant 0 : i32
    %c0_i32_1 = arith.constant 0 : i32
    return %arg0, %2, %c0_i32_0 : i32, i32, i32
  }
  func.func @transform_1(%arg0: i32, %arg1: i32) -> (i32, i32, i32) {
    %c0_i32 = arith.constant 0 : i32
    %c0_i32_0 = arith.constant 0 : i32
    return %arg0, %arg1, %c0_i32 : i32, i32, i32
  }
  func.func @transform_2(%arg0: i32, %arg1: i32) -> (i32, i32, i32) {
    %c1_i32 = arith.constant 1 : i32
    %0 = arith.addi %arg1, %c1_i32 : i32
    %c2_i32 = arith.constant 2 : i32
    %1 = arith.muli %0, %c2_i32 : i32
    %c1_i32_0 = arith.constant 1 : i32
    %2 = arith.minsi %1, %c1_i32_0 : i32
    %c0_i32 = arith.constant 0 : i32
    %c0_i32_1 = arith.constant 0 : i32
    return %arg0, %2, %c0_i32 : i32, i32, i32
  }
  func.func @transform_3(%arg0: i32, %arg1: i32) -> (i32, i32) {
    %c0_i32 = arith.constant 0 : i32
    %c0_i32_0 = arith.constant 0 : i32
    %c0_i32_1 = arith.constant 0 : i32
    return %c0_i32, %c0_i32_0 : i32, i32
  }
  func.func @transform_4(%arg0: i32, %arg1: i32) -> (i32, i32) {
    %c0_i32 = arith.constant 0 : i32
    %c0_i32_0 = arith.constant 0 : i32
    %c0_i32_1 = arith.constant 0 : i32
    return %c0_i32, %c0_i32_0 : i32, i32
  }
  func.func @transform_5(%arg0: i32, %arg1: i32) -> (i32, i32) {
    %c0_i32 = arith.constant 0 : i32
    %c0_i32_0 = arith.constant 0 : i32
    %c0_i32_1 = arith.constant 0 : i32
    return %c0_i32, %c0_i32_0 : i32, i32
  }
  func.func @transform_6(%arg0: i32, %arg1: i32) -> (i32, i32, i32) {
    %c0_i32 = arith.constant 0 : i32
    %c0_i32_0 = arith.constant 0 : i32
    return %arg0, %arg1, %c0_i32 : i32, i32, i32
  }
}

</mosaic_0001>

<bundles_post_ra>
// kernel: tpu_custom_call.1
= control target key start
LH: loop header
LB: loop body
LE: loop exit
PB: predicated region body
PF: predicated region fallthrough
CT: control target
= control target key end

     0   :  { %s2390_s0 = inlined_call_operand.hbm [shape: bf16[2,16,128], index: 0, kind: input, shape index: {}]   ;;  %s2391_s1 = inlined_call_operand.hbm [shape: bf16[2,16,128], index: 1, kind: input, shape index: {}]   ;;  %s2392_s2 = inlined_call_operand.hbm [shape: bf16[2,16,128], index: 2, kind: input, shape index: {}]   ;;  %s2393_s3 = inlined_call_operand.hbm [shape: bf16[896,128], index: 3, kind: input, shape index: {}]   ;;  %s2394_s4 = inlined_call_operand.vmem [shape: f32[1,128], index: 4, kind: input, shape index: {}]   ;;  %s2395_s5 = inlined_call_operand.vmem [shape: f32[1,128], index: 5, kind: input, shape index: {}]   ;;  %s2396_s6 = inlined_call_operand.hbm [shape: bf16[2,16,128], index: 6, kind: output, shape index: {}]  }
   0x1   :  { %2416 = sst [smem:[#allocation23_spill]] %s2391_s1 }
   0x2   :  { %11 = vsyncpa [#allocation4], 0 }
   0x3   :  { %13 = vsyncpa [#allocation4 + $0x1], 0 }
   0x4   :  { %14 = vsyncpa [#allocation7], 0 }
   0x5   :  { %16 = vsyncpa [#allocation7 + $0x1], 0 }
   0x6   :  { %17 = vsyncpa [#allocation10], 0 }
   0x7   :  { %18 = vsyncpa [#allocation5], 0 }
   0x8   :  { %20 = vsyncpa [#allocation5 + $0x1], 0  ;;  %s2049_s21 = smov 0   ;;  %s2051_s22 = smov 0  }
   0x9   :  { %s2053_s23 = smov 0   ;;  %s2055_s24 = smov 0  }
   0xa   :  { %s2057_s25 = smov 0   ;;  %s2059_s26 = smov 0  }
   0xb LB: > { %2417 = sst [smem:[#allocation16_spill]] %s1980_s21  ;;  %s38_s27 = sadd.s32 1, %s1996_s25  ;;  %s2000_s26 = sphi %s2059_s26, %s26_s26   ;;  %s1996_s25 = sphi %s2057_s25, %s2456_s25   ;;  %s1992_s24 = sphi %s2055_s24, %s2452_s24   ;;  %s1988_s23 = sphi %s2053_s23, %s2451_s23   ;;  %s1984_s22 = sphi %s2051_s22, %s2455_s22   ;;  %s1980_s21 = sphi %s2049_s21, %s2454_s21  }
   0xc   : > { %2418 = sst [smem:[#allocation17_spill]] %s1988_s23  ;;  %s55_s28 = sadd.s32 1, %s1988_s23 }
   0xd   : > { %2419 = sst [smem:[#allocation18_spill]] %s1996_s25  ;;  %p40_p0 = scmp.ge.s32.totalorder %s38_s27, 2 }
   0xe   : > { %2420 = sst [smem:[#allocation19_spill]] %s2000_s26  ;;  %p2397_p1 = scmp.ne.s32.totalorder %s1988_s23, %s1984_s22 }
   0xf   : > { %p63_p2 = scmp.eq.s32.totalorder %s2000_s26, 0  ;;  %s2458_s27 = smov (%p40_p0, %s38_s27), 0 }
  0x10   : > { %2421 = sst [smem:[#allocation20_spill]] %s2458_s27  ;;  %s50_s29 = ssub.s32 %s1996_s25, %s2458_s27 }
  0x11   : > { %p64_p3 = por %p63_p2, %p2397_p1  ;;  %p53_p5 = scmp.eq.s32.totalorder %s50_s29, 0 }
  0x12   : > { %p1675_p6 = scmp.lt.s32.totalorder %s2000_s26, 2  ;;  %s2094_s30 = sand.u32 1, %s1988_s23  }
  0x13   : > { %s2097_s7 = sshll.u32 %s1996_s25, 7  ;;  %s290_s10 = sand.u32 1, %s2000_s26  }
  0x14   : > { %s2100_s8 = scalar_select %p53_p5, %s1988_s23, %s55_s28  }
  0x15   : > { %p2102_p7 = pnand %p1675_p6, %p64_p3  ;;  %s1456_s11 = sshll.u32 %s2094_s30, 3 }
  0x16   : > { %2422 = sst [smem:[#allocation21_spill]] %s2100_s8  ;;  %s2424_s1 = sld [smem:[#allocation23_spill]] }
  0x17   : > { %s2423_s9 = scalar_select %p2102_p7, 1, 0 }
  0x18   : > { %s294_s15 = scalar_lea.vmem [#allocation6], %s1456_s11  ;;  %s2116_s17 = scalar_lea.sflag [#allocation7], %s290_s10 }
  0x19   : > { %s303_s16 = sshll.u32 %s294_s15, 4  ;;  %p2122_p9 = pneg %p2102_p7  ;;  %s2114_s16 = int_to_ptr.vmem [resolvable:$true] %s303_s16 }
  0x1b   : > { %s2425_s19 = scalar_select %p2122_p9, 1, 0 }
  0x1c   : > { %s2112_s14 = scalar_lea.hbm %s2424_s1, %s2097_s7  ;;  %s1797_s29 = scalar_lea.hbm %s2424_s1, 256 }
  0x1d   : > { %s1792_s18 = scalar_lea.hbm %s2112_s14, 128  ;;  %p1798_p12 = scmp.lt.u32.totalorder %s2112_s14, %s2424_s1 }
  0x1e   : > { %p1793_p8 = scmp.ne.s32.totalorder %s2112_s14, %s1792_s18  ;;  %p1799_p13 = scmp.lt.u32.totalorder %s1797_s29, %s1792_s18 }
  0x1f   : > { %p1801_p2 = scmp.lt.u32.totalorder %s1792_s18, %s2112_s14 }
  0x20   : > { %p1795_p10 = pnand %p2122_p9, %p1793_p8  ;;  %p1800_p0 = por %p1799_p13, %p1798_p12 }
  0x22   : > { %p1796_p11 = pneg %p1795_p10  ;;  %p1802_p3 = por %p1801_p2, %p1800_p0 }
  0x24   : > { %p1803_p5 = pnand %p1802_p3, %p1796_p11 }
  0x26   : > { %1806 = shalt.err (!%p1803_p5)
}
  0x27   : > { %s1807_s10 = scalar_lea.vmem %s2114_s16, 128  ;;  %s2002_s13 = smov [#allocation6]  }
  0x28   : > { %p1808_p6 = scmp.ne.s32.totalorder %s2114_s16, %s1807_s10  ;;  %s1812_s15 = sshll.u32 %s2002_s13, 4  ;;  %s1813_s15 = int_to_ptr.vmem [resolvable:$false] %s1812_s15 }
  0x29   : > { %s1814_s20 = scalar_lea.vmem %s1813_s15, 256  ;;  %p1815_p4 = scmp.lt.s32.totalorder %s2114_s16, %s1813_s15 }
  0x2a   : > { %p1810_p8 = pnand %p1808_p6, %p2122_p9  ;;  %p1816_p1 = scmp.lt.s32.totalorder %s1814_s20, %s1807_s10 }
  0x2c   : > { %p1811_p10 = pneg %p1810_p8  ;;  %p1817_p12 = por %p1816_p1, %p1815_p4 }
  0x2e   : > { %p1818_p13 = pnand %p1817_p12, %p1811_p10 }
  0x30   : > { %1821 = shalt.err (!%p1818_p13)
}
  0x31   : > { %s2398_s18 = smov 64   ;;  %s2399_s28 = smov 4  }
  0x32   : > { %1666 = dma.hbm_to_vmem [thread:$0]  (!%p2102_p7), %s2112_s14, 128, %s2114_s16, %s2116_s17, %s2398_s18, %s2398_s18, %s2399_s28  }
  0x33   : > { %s2150_s29 = sadd.s32 4294967295, %s2000_s26   ;;  %s1449_s11 = sadd.s32 4294967294, %s2000_s26  }
  0x34   : > { %p68_p1 = scmp.ne.s32.totalorder %s1984_s22, %s1980_s21  ;;  %p2407_p4 = scmp.eq.s32.totalorder %s2150_s29, 0 }
  0x35   : > { %p221_p11 = scmp.eq.s32.totalorder %s2150_s29, 1  ;;  %p227_p0 = scmp.eq.s32.totalorder %s1449_s11, 1 }
  0x36   : > { %p1450_p2 = scmp.ge.s32.totalorder %s2000_s26, 1  ;;  %p2160_p3 = por %p2407_p4, %p68_p1 }
  0x37   : > { %p2427_p5 = scmp.ne.s32.totalorder %s1988_s23, %s1984_s22  ;;  %p2171_p8 = por %p227_p0, %p68_p1 }
  0x38   : > { %s2426_s12 = scalar_select %p2160_p3, 1, 0 }
  0x39   : > { %p2167_p6 = por %p221_p11, %p2427_p5  ;;  %p234_p10 = scmp.lt.s32.totalorder %s2000_s26, 3 }
  0x3a   : > { %s2429_s16 = scalar_select %p2171_p8, 1, 0 }
  0x3b   : > { %s2428_s14 = scalar_select %p2167_p6, 1, 0 }
  0x3c   : > { %2430 = sst [smem:[#allocation22_spill]] %s2429_s16  ;;  %p2176_p12 = pnand %p1450_p2, %p234_p10 }
  0x3d   : > { %s2005_s13 = smov [#allocation9]   ;;  %s2415_s20 = sshll.u32 %s2094_s30, 2 }
  0x3e   : > { %s2431_s10 = scalar_select %p2176_p12, 1, 0 }
  0x3f   : > { %s246_s15 = sshll.u32 %s2005_s13, 4  ;;  %p1656_p13 = pneg %p2176_p12  ;;  %s2180_s15 = int_to_ptr.vmem [resolvable:$true] %s246_s15 }
  0x40   : > { %s2189_s28 = scalar_lea.hbm %s2390_s0, %s2097_s7  ;;  %s270_s27 = scalar_lea.vmem [#allocation3], %s2415_s20 }
  0x41   : > { %p2193_p1 = pnand %p1656_p13, %p2407_p4  ;;  %s283_s25 = sshll.u32 %s270_s27, 4  ;;  %s2199_s25 = int_to_ptr.vmem [resolvable:$true] %s283_s25 }
  0x42   : > { %s1822_s26 = scalar_lea.hbm %s2393_s3, 7168 }
  0x43   : > { %p1823_p11 = scmp.ne.s32.totalorder %s2393_s3, %s1822_s26  ;;  %p1824_p0 = pneg %p2193_p1 }
  0x44   : > { %p1829_p10 = scmp.lt.u32.totalorder %s1822_s26, %s2393_s3 }
  0x45   : > { %p1825_p2 = pnand %p1824_p0, %p1823_p11 }
  0x47   : > { %p1826_p5 = pneg %p1825_p2 }
  0x49   : > { %p1831_p13 = pnand %p1829_p10, %p1826_p5 }
  0x4b   : > { %1834 = shalt.err (!%p1831_p13)
}
  0x4c   : > { %s1835_s27 = scalar_lea.vmem %s2180_s15, 7168  ;;  %p1843_p3 = scmp.lt.s32.totalorder %s2180_s15, %s2180_s15 }
  0x4d   : > { %p1836_p4 = scmp.ne.s32.totalorder %s2180_s15, %s1835_s27  ;;  %p1844_p12 = scmp.lt.s32.totalorder %s1835_s27, %s1835_s27 }
  0x4f   : > { %p1838_p8 = pnand %p1836_p4, %p1824_p0  ;;  %p1845_p7 = por %p1844_p12, %p1843_p3 }
  0x51   : > { %p1839_p6 = pneg %p1838_p8 }
  0x53   : > { %p1846_p9 = pnand %p1845_p7, %p1839_p6 }
  0x55   : > { %1849 = shalt.err (!%p1846_p9)
}
  0x56   : > { %s2433_s23 = smov 4   ;;  %s2434_s21 = smov 64  }
  0x57   : > { %1659 = dma.hbm_to_vmem [thread:$0]  (!%p2193_p1), %s2393_s3, 7168, %s2180_s15, [#allocation10], %s2434_s21, %s2434_s21, %s2433_s23  }
  0x58   : > { %s267_s16 = scalar_lea.sflag [#allocation4], %s2094_s30  ;;  %s1850_s18 = scalar_lea.hbm %s2189_s28, 64 }
  0x59   : > { %p1851_p7 = scmp.ne.s32.totalorder %s2189_s28, %s1850_s18  ;;  %p2435_p9 = scmp.ne.s32.totalorder %s2425_s19, 0 }
  0x5a   : > { %s1855_s27 = scalar_lea.hbm %s2390_s0, 256  ;;  %p1856_p6 = scmp.lt.u32.totalorder %s2189_s28, %s2390_s0 }
  0x5b   : > { %p1853_p4 = pnand %p1851_p7, %p2435_p9  ;;  %p1857_p8 = scmp.lt.u32.totalorder %s1855_s27, %s1850_s18 }
  0x5c   : > { %p1859_p11 = scmp.lt.u32.totalorder %s1850_s18, %s2189_s28 }
  0x5d   : > { %p1854_p3 = pneg %p1853_p4  ;;  %p1858_p12 = por %p1857_p8, %p1856_p6 }
  0x5f   : > { %p1860_p0 = por %p1859_p11, %p1858_p12 }
  0x61   : > { %p1861_p2 = pnand %p1860_p0, %p1854_p3 }
  0x63   : > { %1864 = shalt.err (!%p1861_p2)
}
  0x64   : > { %s1865_s15 = scalar_lea.vmem %s2199_s25, 64  ;;  %s2006_s23 = smov [#allocation3]  }
  0x65   : > { %p1866_p1 = scmp.ne.s32.totalorder %s2199_s25, %s1865_s15  ;;  %s1870_s21 = sshll.u32 %s2006_s23, 4  ;;  %s1871_s21 = int_to_ptr.vmem [resolvable:$false] %s1870_s21 }
  0x66   : > { %s1872_s20 = scalar_lea.vmem %s1871_s21, 128  ;;  %p1873_p13 = scmp.lt.s32.totalorder %s2199_s25, %s1871_s21 }
  0x67   : > { %p1868_p5 = pnand %p1866_p1, %p2435_p9  ;;  %p1874_p7 = scmp.lt.s32.totalorder %s1872_s20, %s1865_s15 }
  0x69   : > { %p1869_p10 = pneg %p1868_p5  ;;  %p1875_p4 = por %p1874_p7, %p1873_p13 }
  0x6b   : > { %p1876_p6 = pnand %p1875_p4, %p1869_p10 }
  0x6d   : > { %1879 = shalt.err (!%p1876_p6)
}
  0x6e   : > { %p2436_p3 = scmp.ne.s32.totalorder %s2423_s9, 0  ;;  %s2437_s13 = sadd.s32 64, %s2097_s7 }
  0x6f   : > { %s2253_s18 = scalar_lea.hbm %s2392_s2, %s2437_s13  ;;  %s2438_s1 = sshll.u32 %s2094_s30, 2 }
  0x70   : > { %1663 = dma.hbm_to_vmem [thread:$0]  (!%p2436_p3), %s2189_s28, 64, %s2199_s25, %s267_s16  }
  0x71   : > { %s317_s11 = scalar_lea.vmem [#allocation8], %s2438_s1  ;;  %s1880_s15 = scalar_lea.hbm %s2253_s18, 64 }
  0x72   : > { %s330_s27 = sshll.u32 %s317_s11, 4  ;;  %p1881_p8 = scmp.ne.s32.totalorder %s2253_s18, %s1880_s15  ;;  %s331_s27 = int_to_ptr.vmem [resolvable:$true] %s330_s27 }
  0x73   : > { %s1885_s28 = scalar_lea.hbm %s2392_s2, 256  ;;  %p1886_p0 = scmp.lt.u32.totalorder %s2253_s18, %s2392_s2 }
  0x74   : > { %p1883_p12 = pnand %p1881_p8, %p2435_p9  ;;  %p1887_p2 = scmp.lt.u32.totalorder %s1885_s28, %s1880_s15 }
  0x75   : > { %p1889_p5 = scmp.lt.u32.totalorder %s1880_s15, %s2253_s18 }
  0x76   : > { %p1884_p11 = pneg %p1883_p12  ;;  %p1888_p1 = por %p1887_p2, %p1886_p0 }
  0x78   : > { %p1890_p10 = por %p1889_p5, %p1888_p1 }
  0x7a   : > { %p1891_p13 = pnand %p1890_p10, %p1884_p11 }
  0x7c   : > { %1894 = shalt.err (!%p1891_p13)
}
  0x7d   : > { %s1895_s30 = scalar_lea.vmem %s331_s27, 64  ;;  %s2007_s21 = smov [#allocation8]  }
  0x7e   : > { %p1896_p7 = scmp.ne.s32.totalorder %s331_s27, %s1895_s30  ;;  %s1900_s20 = sshll.u32 %s2007_s21, 4  ;;  %s1901_s20 = int_to_ptr.vmem [resolvable:$false] %s1900_s20 }
  0x7f   : > { %s1902_s13 = scalar_lea.vmem %s1901_s20, 128  ;;  %p1903_p8 = scmp.lt.s32.totalorder %s331_s27, %s1901_s20 }
  0x80   : > { %p1898_p4 = pnand %p1896_p7, %p2435_p9  ;;  %p1904_p12 = scmp.lt.s32.totalorder %s1902_s13, %s1895_s30 }
  0x82   : > { %p1899_p6 = pneg %p1898_p4  ;;  %p1905_p3 = por %p1904_p12, %p1903_p8 }
  0x84   : > { %p1906_p0 = pnand %p1905_p3, %p1899_p6 }
  0x86   : > { %1909 = shalt.err (!%p1906_p0)
}
  0x87   : > { %p2439_p2 = scmp.ne.s32.totalorder %s2423_s9, 0  ;;  %p2440_p11 = scmp.ne.s32.totalorder %s2431_s10, 0 }
  0x88   : > { %s2278_s19 = sand.u32 (!%p2440_p11), 1, %s1984_s22   ;;  %p2441_p9 = scmp.ne.s32.totalorder (!%p2440_p11), %s2426_s12, 0 }
  0x89   : > { %1669 = dma.hbm_to_vmem [thread:$0]  (!%p2439_p2), %s2253_s18, 64, %s331_s27, %s2116_s17  }
  0x8a   : > { %339 = sbr.rel (%p2440_p11) target bundleno = 465 (0x1d1), region = 44  ;;  %s342_s26 = scalar_lea.sflag (!%p2440_p11), [#allocation4], %s2278_s19 }
  0x91   : > { %1963 = dma.done.wait (%p2441_p9), %s342_s26, 64  }
  0x92   : > { %1965 = vsyncadd (%p2441_p9), %s342_s26, 4294967232  ;;  %s350_s9 = sand.u32 1, %s2150_s29   ;;  %s1464_s17 = sshll.u32 %s2278_s19, 3 }
  0x93   : > { %s351_s8 = scalar_lea.sflag [#allocation7], %s350_s9  ;;  %s2289_s10 = scalar_lea.vmem [#allocation6], %s1464_s17 }
  0x94   : > { %1967 = dma.done.wait (%p2441_p9), %s351_s8, 192  }
  0x95   : > { %1969 = vsyncadd (%p2441_p9), %s351_s8, 4294967104  ;;  %p2442_p3 = scmp.eq.s32.totalorder %s2150_s29, 0 }
  0x97   : > { %1971 = dma.done.wait (%p2442_p3), [#allocation10], 7168   ;;  %p2443_p1 = pmov %p2442_p3 }
  0x98   : > { %v2008_v0 = vmov 0   ;;  %v1734_v2 = vld [vmem:[#allocation9 + $0x40] sm:$0xff]   ;;  %v1738_v6 = vld [vmem:[#allocation9 + $0x48] sm:$0xff]   ;;  %v1742_v10 = vld [vmem:[#allocation9 + $0x50] sm:$0xff]   ;;  %v2009_v37 = vmov 0.0   ;;  %vm473_vm3 = vcmask 1046528  }
  0x99   : > { %1973 = vsyncadd (%p2443_p1), [#allocation10], 4294960128  ;;  %424 = vst [vmem:[#allocation2] sm:$0xf] %v2008_v0  ;;  %v1470_v1 = vcombine.low %v2008_v0, %v2008_v0  ;;  %v1735_v3 = vld [vmem:[#allocation9 + $0xc0] sm:$0xff]   ;;  %1549 = vmatprep.subr.bf16.mxu0 %v1734_v2  ;;  %v1739_v7 = vld [vmem:[#allocation9 + $0xc8] sm:$0xff]  }
  0x9a   : > { %v1736_v4 = vld [vmem:[#allocation9] sm:$0xff]   ;;  %1571 = vmatprep.subr.bf16.mxu1 %v1735_v3  ;;  %v1740_v8 = vld [vmem:[#allocation9 + $0x8] sm:$0xff]   ;;  %v1743_v11 = vld [vmem:[#allocation9 + $0xd0] sm:$0xff]   ;;  %vm455_vm0 = vsmask.f32 7424  ;;  %vm2010_vm4 = vmmov 0  }
  0x9b   : > { %446 = vst [vmem:[#allocation2 + $0x8] sm:$0xf0] %v1470_v1  ;;  %v1737_v5 = vld [vmem:[#allocation9 + $0x80] sm:$0xff]   ;;  %1550 = vmatpush3.bf16.msra.mxu0 %v1736_v4  ;;  %v1741_v9 = vld [vmem:[#allocation9 + $0x88] sm:$0xff]   ;;  %v1744_v12 = vld [vmem:[#allocation9 + $0x10] sm:$0xff]   ;;  %vm497_vm5 = vcmask 1045504  }
  0x9c   : > { %1572 = vmatpush3.bf16.msra.mxu1 %v1737_v5  ;;  %1551 = vmatprep.subr.bf16.mxu0 %v1738_v6  ;;  %v1745_v13 = vld [vmem:[#allocation9 + $0x90] sm:$0xff]   ;;  %v1746_v14 = vld [vmem:[#allocation9 + $0x58] sm:$0xff]   ;;  %v1750_v18 = vld [vmem:[#allocation9 + $0x60] sm:$0xff]   ;;  %vm477_vm1 = vsmask.f32 6400  ;;  %vm521_vm6 = vcmask 1044480  }
  0x9d   : > { %1573 = vmatprep.subr.bf16.mxu1 %v1739_v7  ;;  %v1747_v15 = vld [vmem:[#allocation9 + $0xd8] sm:$0xff]   ;;  %v1751_v19 = vld [vmem:[#allocation9 + $0xe0] sm:$0xff]   ;;  %v1754_v22 = vld [vmem:[#allocation9 + $0x68] sm:$0xff]   ;;  %vm501_vm2 = vsmask.f32 5376  ;;  %s1542_s11 = sshll.u32 %s1992_s24, 7 }
  0x9e   : > { %v1748_v16 = vld [vmem:[#allocation9 + $0x18] sm:$0xff]   ;;  %v1752_v20 = vld [vmem:[#allocation9 + $0x20] sm:$0xff]   ;;  %v1755_v23 = vld [vmem:[#allocation9 + $0xe8] sm:$0xff]   ;;  %s405_s27 = scalar_lea.vmem [#allocation11], %s1464_s17  ;;  %s2339_s28 = scalar_lea.hbm %s2396_s6, %s1542_s11 }
  0x9f   : > { %1552 = vmatpush3.bf16.msra.mxu0 %v1740_v8  ;;  %v1749_v17 = vld [vmem:[#allocation9 + $0x98] sm:$0xff]   ;;  %v1753_v21 = vld [vmem:[#allocation9 + $0xa0] sm:$0xff]   ;;  %v1756_v24 = vld [vmem:[#allocation9 + $0x28] sm:$0xff]   ;;  %s1304_s15 = sshll.u32 %s405_s27, 4  ;;  %s1289_s16 = scalar_lea.sflag [#allocation5], %s2278_s19  ;;  %s2341_s15 = int_to_ptr.vmem [resolvable:$true] %s1304_s15 }
  0xa0   : > { %1574 = vmatpush3.bf16.msra.mxu1 %v1741_v9  ;;  %1553 = vmatprep.subr.bf16.mxu0 %v1742_v10  ;;  %v1757_v25 = vld [vmem:[#allocation9 + $0xa8] sm:$0xff]   ;;  %v1758_v26 = vld [vmem:[#allocation9 + $0x70] sm:$0xff]   ;;  %v1762_v30 = vld [vmem:[#allocation9 + $0x78] sm:$0xff]   ;;  %s1910_s23 = scalar_lea.vmem %s2341_s15, 128  ;;  %p2444_p10 = scmp.ne.s32.totalorder %s2428_s14, 0 }
  0xa1   : > { %1575 = vmatprep.subr.bf16.mxu1 %v1743_v11  ;;  %v1759_v27 = vld [vmem:[#allocation9 + $0xf0] sm:$0xff]   ;;  %v1763_v31 = vld [vmem:[#allocation9 + $0xf8] sm:$0xff]   ;;  %v1768_v36 = vld [vmem:[#allocation9 + $0x140] sm:$0xff]   ;;  %p1911_p5 = scmp.ne.s32.totalorder %s2341_s15, %s1910_s23  ;;  %s2011_s24 = smov [#allocation11]  }
  0xa2   : > { %v1760_v28 = vld [vmem:[#allocation9 + $0x30] sm:$0xff]   ;;  %v1764_v32 = vld [vmem:[#allocation9 + $0x38] sm:$0xff]   ;;  %s1914_s30 = sshll.u32 %s2011_s24, 4  ;;  %s1915_s30 = int_to_ptr.vmem [resolvable:$false] %s1914_s30 }
  0xa3   : > { %1554 = vmatpush3.bf16.msra.mxu0 %v1744_v12  ;;  %v1761_v29 = vld [vmem:[#allocation9 + $0xb0] sm:$0xff]   ;;  %v1765_v33 = vld [vmem:[#allocation9 + $0xb8] sm:$0xff]   ;;  %p1912_p13 = pnand %p1911_p5, %p2444_p10  ;;  %s1916_s21 = scalar_lea.vmem %s1915_s30, 256 }
  0xa4   : > { %1576 = vmatpush3.bf16.msra.mxu1 %v1745_v13  ;;  %1555 = vmatprep.subr.bf16.mxu0 %v1746_v14  ;;  %v1766_v34 = vld [vmem:[%s2289_s10] ss:$0 sps:$4 sm:$0xff]   ;;  %v1767_v35 = vld [vmem:[%s2289_s10 + $0x4] ss:$0 sps:$4 sm:$0xff]   ;;  %p1917_p4 = scmp.lt.s32.totalorder %s2341_s15, %s1915_s30  ;;  %p1918_p6 = scmp.lt.s32.totalorder %s1916_s21, %s1910_s23 }
  0xa5   : > { %1577 = vmatprep.subr.bf16.mxu1 %v1747_v15  ;;  %435 = vst [vmem:[#allocation2] sm:$0xf0] %v1766_v34  ;;  %436 = vst [vmem:[#allocation2 + $0x8] sm:$0xf] %v1767_v35  ;;  %p1913_p7 = pneg %p1912_p13 }
  0xa6   : > { %p1919_p8 = por %p1918_p6, %p1917_p4 }
  0xa7   : > { %1556 = vmatpush3.bf16.msra.mxu0 %v1748_v16 }
  0xa8   : > { %1578 = vmatpush3.bf16.msra.mxu1 %v1749_v17  ;;  %1557 = vmatprep.subr.bf16.mxu0 %v1750_v18  ;;  %p1920_p12 = pnand %p1919_p8, %p1913_p7 }
  0xa9   : > { %1579 = vmatprep.subr.bf16.mxu1 %v1751_v19 }
  0xab   : > { %1558 = vmatpush3.bf16.msra.mxu0 %v1752_v20 }
  0xac   : > { %1580 = vmatpush3.bf16.msra.mxu1 %v1753_v21  ;;  %1559 = vmatprep.subr.bf16.mxu0 %v1754_v22  ;;  %v449_v38 = vld [vmem:[#allocation2] sm:$0xf8]  ;;  %v448_v41 = vld [vmem:[#allocation2 + $0x8] sm:$0x7] }
  0xad   : > { %1581 = vmatprep.subr.bf16.mxu1 %v1755_v23  ;;  %v2302_v39 = vld [vmem:[#allocation2] sm:$0xf0]  ;;  %v457_v42 = vshrl.u32 %v449_v38, 16  ;;  %v459_v43 = vshll.u32 %v449_v38, 16  ;;  %v450_v44 = vld [vmem:[#allocation2 + $0x8] sm:$0xf] }
  0xae   : > { %v447_v40 = vld [vmem:[#allocation2] sm:$0xfc]  ;;  %v464_v45 = vshll.u32 %v448_v41, 16  ;;  %v468_v46 = vshrl.u32 %v448_v41, 16  ;;  %v479_v47 = vshrl.u32 %v2302_v39, 16  ;;  %v482_v48 = vshll.u32 %v2302_v39, 16 }
  0xaf   : > { %1560 = vmatpush3.bf16.msra.mxu0 %v1756_v24  ;;  %v461_v49 = vrot.slane %v459_v43, 1  ;;  %v487_v50 = vshrl.u32 %v450_v44, 16  ;;  %v490_v51 = vshll.u32 %v450_v44, 16  ;;  %v638_v52 = vshrl.u32 %v447_v40, 16  ;;  %v1772_v41 = vld [vmem:[#allocation9 + $0x108] sm:$0xff]  }
  0xb0   : > { %1582 = vmatpush3.bf16.msra.mxu1 %v1757_v25  ;;  %1561 = vmatprep.subr.bf16.mxu0 %v1758_v26  ;;  %v466_v53 = vrot.slane %v464_v45, 1  ;;  %v481_v54 = vrot.slane %v479_v47, 1  ;;  %v484_v55 = vrot.slane %v482_v48, 2  ;;  %v641_v56 = vshll.u32 %v447_v40, 16  ;;  %v1769_v25 = vld [vmem:[#allocation9 + $0x100] sm:$0xff]  }
  0xb1   : > { %1583 = vmatprep.subr.bf16.mxu1 %v1759_v27  ;;  %v462_v57 = vor.u32 %v461_v49, %v457_v42  ;;  %v489_v58 = vrot.slane %v487_v50, 1  ;;  %v492_v59 = vrot.slane %v490_v51, 2  ;;  %v640_v60 = vrot.slane %v638_v52, 2  ;;  %v1770_v49 = vld [vmem:[#allocation9 + $0x180] sm:$0xff]   ;;  %v1773_v51 = vld [vmem:[#allocation9 + $0x188] sm:$0xff]   ;;  %v1775_v52 = vld [vmem:[#allocation9 + $0x110] sm:$0xff]  }
  0xb2   : > { %v470_v61 = vor.u32 %v468_v46, %v466_v53  ;;  %v485_v62 = vor.u32 %v484_v55, %v481_v54  ;;  %v643_v63 = vrot.slane %v641_v56, 3  ;;  %v645_v0 = vrot.slane %v468_v46, 2  ;;  %v1774_v46 = vld [vmem:[#allocation9 + $0x150] sm:$0xff]   ;;  %v452_v54 = vld [vmem:[#allocation2 + $0x8] sm:$0x1f] }
  0xb3   : > { %1562 = vmatpush3.bf16.msra.mxu0 %v1760_v28  ;;  %v467_v1 = vsel %vm455_vm0, %v462_v57, %v466_v53  ;;  %v493_v2 = vor.u32 %v492_v59, %v489_v58  ;;  %v646_v3 = vrot.slane %v464_v45, 3  ;;  %v474_v4 = vrot.slane %v449_v38, 1  ;;  %v1777_v53 = vld [vmem:[#allocation9 + $0x158] sm:$0xff]   ;;  %v453_v55 = vld [vmem:[#allocation2] sm:$0xe0] }
  0xb4   : > { %1584 = vmatpush3.bf16.msra.mxu1 %v1761_v29  ;;  %1563 = vmatprep.subr.bf16.mxu0 %v1762_v30  ;;  %v650_v5 = vshrl.u32 %v467_v1, 16  ;;  %v653_v6 = vshll.u32 %v467_v1, 16  ;;  %v658_v7 = vshrl.u32 %v470_v61, 16  ;;  %v661_v8 = vshll.u32 %v470_v61, 16  ;;  %v1780_v1 = vld [vmem:[#allocation9 + $0x160] sm:$0xff]  }
  0xb5   : > { %1585 = vmatprep.subr.bf16.mxu1 %v1763_v31  ;;  %v494_v9 = vsel %vm477_vm1, %v485_v62, %v493_v2  ;;  %v692_v10 = vshrl.u32 %v493_v2, 16  ;;  %v695_v11 = vshll.u32 %v493_v2, 16  ;;  %v644_v12 = vor.u32 %v643_v63, %v640_v60  ;;  %v1778_v60 = vld [vmem:[#allocation9 + $0x118] sm:$0xff]  }
  0xb6   : > { %v652_v13 = vrot.slane %v650_v5, 2  ;;  %v655_v14 = vrot.slane %v653_v6, 3  ;;  %v660_v15 = vrot.slane %v658_v7, 2  ;;  %v663_v16 = vrot.slane %v661_v8, 3  ;;  %v1781_v7 = vld [vmem:[#allocation9 + $0x120] sm:$0xff]  }
  0xb7   : > { %1564 = vmatpush3.bf16.msra.mxu0 %v1764_v32  ;;  %v684_v17 = vshrl.u32 %v494_v9, 16  ;;  %v687_v18 = vshll.u32 %v494_v9, 16  ;;  %v694_v19 = vrot.slane %v692_v10, 2  ;;  %v697_v20 = vrot.slane %v695_v11, 3  ;;  %v454_v11 = vld [vmem:[#allocation2 + $0x8] sm:$0x3f] }
  0xb8   : > { %1586 = vmatpush3.bf16.msra.mxu1 %v1765_v33  ;;  %1593 = vmatprep.subr.bf16.mxu0 %v1768_v36  ;;  %v656_v21 = vor.u32 %v655_v14, %v652_v13  ;;  %v664_v22 = vor.u32 %v663_v16, %v660_v15  ;;  %v647_v23 = vor.u32 %v646_v3, %v645_v0  ;;  %v475_v24 = vrot.slane %v450_v44, 1  ;;  %v1771_v33 = vld [vmem:[#allocation9 + $0x148] sm:$0xff]   ;;  %v1779_v14 = vld [vmem:[#allocation9 + $0x198] sm:$0xff]  }
  0xb9   : > { %1624 = vmatprep.subr.bf16.mxu1 %v2009_v37  ;;  %v686_v26 = vrot.slane %v684_v17, 2  ;;  %v689_v27 = vrot.slane %v687_v18, 3  ;;  %v698_v28 = vor.u32 %v697_v20, %v694_v19  ;;  %v511_v56 = vshrl.u32 %v452_v54, 16 }
  0xba   : > { %v665_v29 = vsel %vm501_vm2, %v656_v21, %v664_v22  ;;  %v648_v30 = vsel %vm501_vm2, %v644_v12, %v647_v23  ;;  %v476_v31 = vsel %vm473_vm3, %v474_v4, %v475_v24  ;;  %v675_v32 = vshrl.u32 %v475_v24, 16  ;;  %v1776_v4 = vld [vmem:[#allocation9 + $0x190] sm:$0xff]   ;;  %v1784_v23 = vld [vmem:[#allocation9 + $0x128] sm:$0xff]  }
  0xbb   : > { %1126 = vmatprep.mubr.bf16.mxu0 %v665_v29  ;;  %v690_v34 = vor.u32 %v689_v27, %v686_v26  ;;  %v667_v35 = vshrl.u32 %v476_v31, 16  ;;  %v670_v36 = vshll.u32 %v476_v31, 16  ;;  %v678_v38 = vshll.u32 %v475_v24, 16  ;;  %v1782_v29 = vld [vmem:[#allocation9 + $0x1a0] sm:$0xff]  }
  0xbc   : > { %1127 = vmatmul.mubr.bf16.vlgmr.msra.gmra.mrb[0].mxu0 %v648_v30  ;;  %v677_v40 = vrot.slane %v675_v32, 2  ;;  %v514_v57 = vshll.u32 %v452_v54, 16  ;;  %v503_v58 = vshrl.u32 %v453_v55, 16  ;;  %v506_v59 = vshll.u32 %v453_v55, 16 }
  0xbd   : > { %v699_v42 = vsel %vm501_vm2, %v690_v34, %v698_v28  ;;  %v669_v43 = vrot.slane %v667_v35, 2  ;;  %v672_v44 = vrot.slane %v670_v36, 3  ;;  %v680_v45 = vrot.slane %v678_v38, 3  ;;  %1594 = vmatpush3.bf16.msra.mxu0 %v1769_v25  ;;  %v1786_v28 = vld [vmem:[#allocation9 + $0x170] sm:$0xff]  }
  0xbe   : > { %1167 = vmatprep.mubr.bf16.mxu1 %v699_v42  ;;  %1595 = vmatprep.subr.bf16.mxu0 %v1771_v33  ;;  %v513_v61 = vrot.slane %v511_v56, 2  ;;  %v516_v62 = vrot.slane %v514_v57, 3  ;;  %v498_v63 = vrot.slane %v2302_v39, 2  ;;  %v499_v0 = vrot.slane %v452_v54, 2  ;;  %v1783_v39 = vld [vmem:[#allocation9 + $0x168] sm:$0xff]   ;;  %v1787_v33 = vld [vmem:[#allocation9 + $0x130] sm:$0xff]  }
  0xbf   : > { %v673_v47 = vor.u32 %v672_v44, %v669_v43  ;;  %v681_v48 = vor.u32 %v680_v45, %v677_v40  ;;  %v505_v2 = vrot.slane %v503_v58, 2  ;;  %v508_v3 = vrot.slane %v506_v59, 3  ;;  %v1789_v40 = vld [vmem:[#allocation9 + $0x178] sm:$0xff]  }
  0xc0   : > { %v517_v5 = vor.u32 %v516_v62, %v513_v61  ;;  %v500_v10 = vsel %vm497_vm5, %v498_v63, %v499_v0  ;;  %v522_v13 = vrot.slane %v453_v55, 3  ;;  %v709_v21 = vshrl.u32 %v499_v0, 16  ;;  %v1791_v55 = vld [vmem:[#allocation9 + $0x1b8] sm:$0xff]  }
  0xc1   : > { %v682_v50 = vsel %vm501_vm2, %v673_v47, %v681_v48  ;;  %1596 = vmatpush3.bf16.msra.mxu0 %v1772_v41  ;;  %v509_v6 = vor.u32 %v508_v3, %v505_v2  ;;  %v701_v19 = vshrl.u32 %v500_v10, 16  ;;  %v704_v20 = vshll.u32 %v500_v10, 16  ;;  %v1785_v41 = vld [vmem:[#allocation9 + $0x1a8] sm:$0xff]  }
  0xc2   : > { %1168 = vmatmul.mubr.bf16.vlgmr.msra.gmra.mrb[0].mxu1 %v682_v50  ;;  %1597 = vmatprep.subr.bf16.mxu0 %v1774_v46  ;;  %v726_v8 = vshrl.u32 %v517_v5, 16  ;;  %v729_v9 = vshll.u32 %v517_v5, 16  ;;  %v523_v22 = vrot.slane %v454_v11, 3  ;;  %v712_v27 = vshll.u32 %v499_v0, 16  ;;  %v1790_v46 = vld [vmem:[#allocation9 + $0x138] sm:$0xff]  }
  0xc3   : > { %1625 = vmatpush3.bf16.msra.mxu1 %v1770_v49  ;;  %1640 = vmatprep.mubr.msk.bf16.mxu1 %vm2010_vm4, %v2009_v37  ;;  %v518_v12 = vsel %vm501_vm2, %v509_v6, %v517_v5  ;;  %v711_v31 = vrot.slane %v709_v21, 2  ;;  %v703_v35 = vrot.slane %v701_v19, 2  ;;  %v706_v36 = vrot.slane %v704_v20, 3  ;;  %v1788_v49 = vld [vmem:[#allocation9 + $0x1b0] sm:$0xff]  }
  0xc4   : > { %1626 = vmatprep.subr.bf16.mxu1 %v2009_v37  ;;  %v718_v15 = vshrl.u32 %v518_v12, 16  ;;  %v721_v16 = vshll.u32 %v518_v12, 16  ;;  %v728_v17 = vrot.slane %v726_v8, 2  ;;  %v731_v18 = vrot.slane %v729_v9, 3  ;;  %v1528_v19 = vld [vmem:[%s2395_s5] ss:$0 sm:$0xff] }
  0xc5   : > { %1598 = vmatpush3.bf16.msra.mxu0 %v1775_v52  ;;  %v524_v32 = vsel %vm521_vm6, %v522_v13, %v523_v22  ;;  %v714_v38 = vrot.slane %v712_v27, 3  ;;  %v743_v44 = vshrl.u32 %v523_v22, 16  ;;  %v746_v45 = vshll.u32 %v523_v22, 16 }
  0xc6   : > { %1599 = vmatprep.subr.bf16.mxu0 %v1777_v53  ;;  %v720_v24 = vrot.slane %v718_v15, 2  ;;  %v723_v25 = vrot.slane %v721_v16, 3  ;;  %v732_v26 = vor.u32 %v731_v18, %v728_v17  ;;  %v735_v42 = vshrl.u32 %v524_v32, 16  ;;  %v1527_v15 = vld [vmem:[%s2394_s4] ss:$0 sm:$0xff] }
  0xc7   : > { %1627 = vmatpush3.bf16.msra.mxu1 %v1773_v51  ;;  %v738_v43 = vshll.u32 %v524_v32, 16  ;;  %v707_v47 = vor.u32 %v706_v36, %v703_v35  ;;  %v715_v48 = vor.u32 %v714_v38, %v711_v31  ;;  %v745_v52 = vrot.slane %v743_v44, 2 }
  0xc8   : > { %1628 = vmatprep.subr.bf16.mxu1 %v2009_v37  ;;  %v724_v30 = vor.u32 %v723_v25, %v720_v24  ;;  %v737_v50 = vrot.slane %v735_v42, 2  ;;  %v748_v53 = vrot.slane %v746_v45, 3 }
  0xc9   : > { %1600 = vmatpush3.bf16.msra.mxu0 %v1778_v60  ;;  %v740_v51 = vrot.slane %v738_v43, 3  ;;  %v716_v54 = vsel %vm501_vm2, %v707_v47, %v715_v48 }
  0xca   : > { %1601 = vmatprep.subr.bf16.mxu0 %v1780_v1  ;;  %v733_v34 = vsel %vm501_vm2, %v724_v30, %v732_v26  ;;  %v749_v57 = vor.u32 %v748_v53, %v745_v52 }
  0xcb   : > { %1629 = vmatpush3.bf16.msra.mxu1 %v1776_v4  ;;  %1208 = vmatprep.mubr.bf16.mxu0 %v733_v34  ;;  %v741_v56 = vor.u32 %v740_v51, %v737_v50 }
  0xcc   : > { %1630 = vmatprep.subr.bf16.mxu1 %v2009_v37 }
  0xcd   : > { %1602 = vmatpush3.bf16.msra.mxu0 %v1781_v7  ;;  %v750_v58 = vsel %vm501_vm2, %v741_v56, %v749_v57 }
  0xce   : > { %1603 = vmatprep.subr.bf16.mxu0 %v1783_v39 }
  0xcf   : > { %1631 = vmatpush3.bf16.msra.mxu1 %v1779_v14 }
  0xd0   : > { %1632 = vmatprep.subr.bf16.mxu1 %v2009_v37 }
  0xd1   : > { %1604 = vmatpush3.bf16.msra.mxu0 %v1784_v23 }
  0xd2   : > { %1605 = vmatprep.subr.bf16.mxu0 %v1786_v28 }
  0xd3   : > { %1633 = vmatpush3.bf16.msra.mxu1 %v1782_v29 }
  0xd4   : > { %1634 = vmatprep.subr.bf16.mxu1 %v2009_v37 }
  0xd5   : > { %1606 = vmatpush3.bf16.msra.mxu0 %v1787_v33 }
  0xd6   : > { %1607 = vmatprep.subr.bf16.mxu0 %v1789_v40 }
  0xd7   : > { %1635 = vmatpush3.bf16.msra.mxu1 %v1785_v41 }
  0xd8   : > { %1636 = vmatprep.subr.bf16.mxu1 %v2009_v37 }
  0xd9   : > { %1608 = vmatpush3.bf16.msra.mxu0 %v1790_v46 }
  0xdb   : > { %1637 = vmatpush3.bf16.msra.mxu1 %v1788_v49 }
  0xdc   : > { %1638 = vmatprep.subr.bf16.mxu1 %v2009_v37  ;;  %1209 = vmatmul.mubr.bf16.vlgmr.msra.gmra.mrb[4].mxu0 %v716_v54 }
  0xdf   : > { %1639 = vmatpush3.bf16.msra.mxu1 %v1791_v55 }
  0xe2   : > { %1641 = vmatmul.mubr.bf16.vlgmr.msra.gmra.mrb[4].mxu1 %v750_v58 }
 0x18f   : > { %v1565_v59 = vpop.f32.mrb[0].mxu0 }
 0x190   : > { %v1566_v60 = vpop.f32.mrb[1].mxu0 }
 0x191   : > { %v1567_v61 = vadd.f32 %v1566_v60, %v1565_v59  ;;  %v1568_v62 = vpop.f32.mrb[2].mxu0 }
 0x192   : > { %v1569_v63 = vpop.f32.mrb[3].mxu0 }
 0x193   : > { %v1570_v0 = vadd.f32 %v1569_v63, %v1568_v62 }
 0x195   : > { %v1587_v1 = vpop.f32.mrb[0].mxu1 }
 0x196   : > { %v1588_v2 = vpop.f32.mrb[1].mxu1 }
 0x197   : > { %v1589_v3 = vadd.f32 %v1588_v2, %v1587_v1  ;;  %v1590_v4 = vpop.f32.mrb[2].mxu1 }
 0x198   : > { %v1591_v5 = vpop.f32.mrb[3].mxu1 }
 0x199   : > { %v1170_v6 = vadd.f32 %v1589_v3, %v1567_v61  ;;  %v1592_v7 = vadd.f32 %v1591_v5, %v1590_v4 }
 0x19b   : > { %v1173_v8 = vadd.f32 %v1592_v7, %v1570_v0 }
 0x1af   : > { %v1609_v37 = vpop.f32.mrb[4].mxu0 }
 0x1b0   : > { %v1610_v9 = vpop.f32.mrb[5].mxu0 }
 0x1b1   : > { %v1611_v10 = vadd.f32 %v1610_v9, %v1609_v37  ;;  %v1612_v11 = vpop.f32.mrb[6].mxu0 }
 0x1b2   : > { %v1613_v39 = vpop.f32.mrb[7].mxu0 }
 0x1b3   : > { %v1211_v12 = vadd.f32 %v1611_v10, %v1170_v6  ;;  %v1614_v13 = vadd.f32 %v1613_v39, %v1612_v11 }
 0x1b5   : > { %v1251_v14 = vpop.f32.mrb[4].mxu1  ;;  %v1214_v16 = vadd.f32 %v1614_v13, %v1173_v8 }
 0x1b6   : > { %v1252_v17 = vadd.f32 %v1251_v14, %v1211_v12  ;;  %v1642_v18 = vpop.f32.mrb[5].mxu1 }
 0x1b7   : > { %v1254_v20 = vpop.f32.mrb[6].mxu1 }
 0x1b8   : > { %v1265_v21 = vmul.f32 %v1527_v15, %v1252_v17  ;;  %v1255_v22 = vadd.f32 %v1254_v20, %v1214_v16  ;;  %v1643_v23 = vpop.f32.mrb[7].mxu1 }
 0x1ba   : > { %v1274_v24 = vadd.f32 %v1528_v19, %v1265_v21  ;;  %v1266_v25 = vmul.f32 %v1527_v15, %v1255_v22 }
 0x1bc   : > { %v1275_v26 = vadd.f32 %v1528_v19, %v1266_v25  ;;  %v1276_v27 = vmax.f32 %v1274_v24, 0.0 }
 0x1be   : > { %v1277_v28 = vmax.f32 %v1275_v26, 0.0 }
 0x1c0   : > { %v1546_v29 = vpack.c.bf16 %v1277_v28, %v1276_v27 }
 0x1c2   : > { %1547 = vst [vmem:[%s405_s27] sm:$0xff] %v1546_v29  }
 0x1c3   : > { %1923 = shalt.err (!%p1920_p12)
}
 0x1c4   : > { %s1924_s20 = scalar_lea.hbm %s2339_s28, 128  ;;  %s1928_s9 = scalar_lea.hbm %s2396_s6, 256 }
 0x1c5   : > { %p1925_p0 = scmp.ne.s32.totalorder %s2339_s28, %s1924_s20  ;;  %p1929_p9 = scmp.lt.u32.totalorder %s2339_s28, %s2396_s6 }
 0x1c6   : > { %p1930_p3 = scmp.lt.u32.totalorder %s1928_s9, %s1924_s20  ;;  %p1932_p5 = scmp.lt.u32.totalorder %s1924_s20, %s2339_s28 }
 0x1c7   : > { %p1926_p2 = pnand %p1925_p0, %p2444_p10 }
 0x1c8   : > { %p1931_p1 = por %p1930_p3, %p1929_p9 }
 0x1c9   : > { %p1927_p11 = pneg %p1926_p2 }
 0x1ca   : > { %p1933_p13 = por %p1932_p5, %p1931_p1 }
 0x1cc   : > { %p1934_p7 = pnand %p1933_p13, %p1927_p11 }
 0x1ce   : > { %1937 = shalt.err (!%p1934_p7)
}
 0x1cf   : > { %s2012_s10 = smov 64   ;;  %s2013_s29 = smov 4  }
 0x1d0   : > { %1654 = dma.vmem_to_hbm [thread:$0]  (%p2444_p10), %s2341_s15, 128, %s2339_s28, %s1289_s16, %s2012_s10, %s2012_s10, %s2013_s29  }
 0x1d1 PF: > { %s2445_s12 = sld [smem:[#allocation16_spill]]  ;;  %s2446_s18 = sld [smem:[#allocation22_spill]] }
 0x1d2   : > { %s2447_s1 = sld [smem:[#allocation19_spill]] }
 0x1d7   : > { %s1319_s11 = sand.u32 1, %s2445_s12   ;;  %p2448_p4 = scmp.ne.s32.totalorder %s2446_s18, 0 }
 0x1d8   : > { %p2449_p6 = scmp.ge.s32.totalorder %s2447_s1, 2  ;;  %s1320_s27 = scalar_lea.sflag [#allocation5], %s1319_s11 }
 0x1da   : > { %p1671_p8 = pnand %p2449_p6, %p2448_p4 }
 0x1dc   : > { %1975 = dma.done.wait (!%p1671_p8), %s1320_s27, 128  }
 0x1dd   : > { %1977 = vsyncadd (!%p1671_p8), %s1320_s27, 4294967168  ;;  %s26_s26 = sadd.s32 1, %s2447_s1   ;;  %s2450_s25 = sld [smem:[#allocation17_spill]] }
 0x1de   : > { %p23_p12 = scmp.ge.s32.totalorder %s26_s26, 4   ;;  %s2451_s23 = sld [smem:[#allocation21_spill]] }
 0x1df   : > { %s2452_s24 = sld [smem:[#allocation18_spill]]  ;;  %s2453_s14 = sld [smem:[#allocation20_spill]] }
 0x1e0   : > { %s2454_s21 = smov %s1984_s22  ;;  %25 = sbr.rel (!%p23_p12) target bundleno = 11 (0xb), region = 117 }
 0x1e3   : > { %s2455_s22 = smov %s2450_s25 }
 0x1e5   : > { %s2456_s25 = smov %s2453_s14 }
 0x1e7   :  { %1325 = vsyncpa [#allocation4], 1 }
 0x1e8   :  { %1327 = vsyncpa [#allocation4 + $0x1], 1 }
 0x1e9   :  { %1328 = vsyncpa [#allocation7], 1 }
 0x1ea   :  { %1330 = vsyncpa [#allocation7 + $0x1], 1 }
 0x1eb   :  { %1331 = vsyncpa [#allocation10], 1 }
 0x1ec   :  { %1332 = vsyncpa [#allocation5], 1 }
 0x1ed   :  { %1334 = vsyncpa [#allocation5 + $0x1], 1 }

</bundles_post_ra>
